<compile_context>
chip_gen: v7x
topology: tpu7x:2x2x1
jax: 0.10.0
libtpu: 0.0.40
codegen_flags: <defaults>
</compile_context>

<pallas_src>
import jax
import jax.numpy as jnp
from jax.experimental import pallas as pl
from jax.experimental.pallas import tpu as pltpu


def _relfeat_kernel(xi_ref, xj_ref, out_ref):
    # Elementwise relative-feature extraction on one (TILE_N, TILE_C) tile.
    out_ref[...] = xi_ref[...] - xj_ref[...]


def _sublane_min(dtype) -> int:
    """Minimum row-tile granularity: sub-32-bit dtypes pack along sublanes."""
    itemsize = jnp.dtype(dtype).itemsize
    if itemsize >= 4:
        return 8
    if itemsize == 2:
        return 16
    return 32


def _round_up(x: int, m: int) -> int:
    return ((x + m - 1) // m) * m


def relfeat_freq_extractor(
    x_i: jax.Array,
    x_j: jax.Array,
    *,
    tile_n: int | None = None,
    tile_c: int | None = None,
    min_bytes_for_pallas: int = 256 * 1024,
) -> jax.Array:
    """Pallas wrapper: rel = x_i - x_j, tiled over (edge, channel) axes.

    x_i, x_j: (N, C) arrays of identical shape/dtype.
    Returns:  (N, C) array of the same dtype.
    """
    assert x_i.shape == x_j.shape, "x_i and x_j must have identical shapes"
    assert x_i.dtype == x_j.dtype, "x_i and x_j must have identical dtypes"
    n, c = x_i.shape
    dtype = x_i.dtype
    itemsize = jnp.dtype(dtype).itemsize

    # Small-input fast path: launch/pipeline setup would dominate the traffic.
    if n * c * itemsize < min_bytes_for_pallas:
        return x_i - x_j

    sub_min = _sublane_min(dtype)

    # Channel tile: split into lane-dense 1024-wide slabs only when C is large
    # and 128-aligned; otherwise keep the full channel axis in one block.
    if tile_c is None:
        tile_c = 1024 if (c % 128 == 0 and c > 1024) else c
    assert tile_c == c or (c % tile_c == 0 and tile_c % 128 == 0), (
        "tile_c must equal C or be a 128-multiple divisor of C"
    )

    # Row tile: target ~2 MiB per buffer -> 3 streams x 2 buffers ~= 12 MiB,
    # inside every generation's scoped VMEM (incl. v7x's smaller budget).
    if tile_n is None:
        target_bytes = 2 * 1024 * 1024
        tile_n = max(sub_min, (target_bytes // (tile_c * itemsize)) // sub_min * sub_min)
        tile_n = min(tile_n, 2048)
    tile_n = _round_up(tile_n, sub_min)
    tile_n = min(tile_n, _round_up(n, sub_min))

    # Remainder handling: pad the edge axis up to a tile multiple, slice back after.
    n_pad = _round_up(n, tile_n)
    if n_pad != n:
        pad = ((0, n_pad - n), (0, 0))
        xi_p = jnp.pad(x_i, pad)
        xj_p = jnp.pad(x_j, pad)
    else:
        xi_p, xj_p = x_i, x_j

    grid = (n_pad // tile_n, c // tile_c)
    spec = pl.BlockSpec((tile_n, tile_c), lambda i, j: (i, j))

    tile_bytes = tile_n * tile_c * itemsize
    vmem_limit = int(max(6 * tile_bytes + (2 << 20), 16 << 20))

    out = pl.pallas_call(
        _relfeat_kernel,
        out_shape=jax.ShapeDtypeStruct((n_pad, c), dtype),
        grid_spec=pltpu.PrefetchScalarGridSpec(
            num_scalar_prefetch=0,
            grid=grid,
            in_specs=[spec, spec],
            out_specs=spec,
        ),
        compiler_params=pltpu.CompilerParams(
            dimension_semantics=("parallel", "parallel"),
            vmem_limit_bytes=vmem_limit,
        ),
    )(xi_p, xj_p)

    return out if n_pad == n else out[:n]


if __name__ == "__main__":
    key = jax.random.PRNGKey(0)
    k1, k2, k3, k4, k5, k6 = jax.random.split(key, 6)

    # Case 1: tiny input — exercises the plain-JAX fast path.
    N0, C0 = 16, 128
    a0 = jax.random.normal(k1, (N0, C0), dtype=jnp.float32)
    b0 = jax.random.normal(k2, (N0, C0), dtype=jnp.float32)
    out0 = jax.block_until_ready(relfeat_freq_extractor(a0, b0))
    assert out0.shape == (N0, C0) and out0.dtype == a0.dtype
    assert jnp.allclose(out0, a0 - b0, atol=1e-6, rtol=1e-6)

    # Case 2: f32, C not a 128-multiple, N not a tile multiple — forces the
    # Pallas path (threshold disabled) and exercises padding + full-C block.
    N1, C1 = 300, 192
    a1 = jax.random.normal(k3, (N1, C1), dtype=jnp.float32)
    b1 = jax.random.normal(k4, (N1, C1), dtype=jnp.float32)
    out1 = jax.block_until_ready(
        relfeat_freq_extractor(a1, b1, min_bytes_for_pallas=0)
    )
    assert out1.shape == (N1, C1) and out1.dtype == a1.dtype
    assert jnp.allclose(out1, a1 - b1, atol=1e-6, rtol=1e-6)

    # Case 3: bf16 — exercises the dtype-aware (16-row) sublane tile rounding.
    N2, C2 = 100, 128
    a2 = jax.random.normal(k5, (N2, C2), dtype=jnp.float32).astype(jnp.bfloat16)
    b2 = jax.random.normal(k6, (N2, C2), dtype=jnp.float32).astype(jnp.bfloat16)
    out2 = jax.block_until_ready(
        relfeat_freq_extractor(a2, b2, min_bytes_for_pallas=0)
    )
    assert out2.shape == (N2, C2) and out2.dtype == jnp.bfloat16
    assert jnp.allclose(
        out2.astype(jnp.float32), (a2 - b2).astype(jnp.float32), atol=1e-2, rtol=1e-2
    )

    print("KERNEL_OK")
</pallas_src>

<mosaic_0001>
module attributes {stable_mosaic.version = 11 : i64} {
  func.func @_relfeat_kernel(%arg0: i32, %arg1: i32, %arg2: memref<304x192xf32, #tpu.memory_space<vmem>>, %arg3: memref<304x192xf32, #tpu.memory_space<vmem>>, %arg4: memref<304x192xf32, #tpu.memory_space<vmem>>) attributes {dimension_semantics = [#tpu.dimension_semantics<parallel>, #tpu.dimension_semantics<parallel>], iteration_bounds = array<i64: 1, 1>, scalar_prefetch = 0 : i64, scratch_operands = 0 : i64, tpu.core_type = #tpu.core_type<tc>, window_params = [{transform_indices = @transform_0, window_bounds = array<i64: 304, 192>}, {transform_indices = @transform_1, window_bounds = array<i64: 304, 192>}, {transform_indices = @transform_2, window_bounds = array<i64: 304, 192>}]} {
    %c0 = arith.constant 0 : index
    %c0_0 = arith.constant 0 : index
    %0 = vector.load %arg2[%c0, %c0_0] : memref<304x192xf32, #tpu.memory_space<vmem>>, vector<304x192xf32>
    %c0_1 = arith.constant 0 : index
    %c0_2 = arith.constant 0 : index
    %1 = vector.load %arg3[%c0_1, %c0_2] : memref<304x192xf32, #tpu.memory_space<vmem>>, vector<304x192xf32>
    %2 = arith.subf %0, %1 : vector<304x192xf32>
    %c0_3 = arith.constant 0 : index
    %c0_4 = arith.constant 0 : index
    %3 = vector.load %arg4[%c0_3, %c0_4] : memref<304x192xf32, #tpu.memory_space<vmem>>, vector<304x192xf32>
    tpu.vector_store %arg4[%c0_3, %c0_4], %2 {strides = array<i32>} : memref<304x192xf32, #tpu.memory_space<vmem>>, vector<304x192xf32>,
    return
  }
  func.func @transform_0(%arg0: i32, %arg1: i32) -> (i32, i32) {
    %c0_i32 = arith.constant 0 : i32
    return %arg0, %arg1 : i32, i32
  }
  func.func @transform_1(%arg0: i32, %arg1: i32) -> (i32, i32) {
    %c0_i32 = arith.constant 0 : i32
    return %arg0, %arg1 : i32, i32
  }
  func.func @transform_2(%arg0: i32, %arg1: i32) -> (i32, i32) {
    %c0_i32 = arith.constant 0 : i32
    return %arg0, %arg1 : i32, i32
  }
}

</mosaic_0001>

<bundles_post_ra>
// kernel: tpu_custom_call.1
= control target key start
LH: loop header
LB: loop body
LE: loop exit
PB: predicated region body
PF: predicated region fallthrough
CT: control target
= control target key end

     0   :  { %vm240_vm0 = vcmask 523264   ;;  %s1057_s0 = inlined_call_operand.vmem [shape: f32[304,192], index: 0, kind: input, shape index: {}]   ;;  %s1058_s1 = inlined_call_operand.vmem [shape: f32[304,192], index: 1, kind: input, shape index: {}]   ;;  %s1059_s2 = inlined_call_operand.vmem [shape: f32[304,192], index: 2, kind: output, shape index: {}]  }
   0x1   :  { %v11_v0 = vld [vmem:[%s1057_s0] sm:$0xff]  ;;  %v12_v2 = vld [vmem:[%s1057_s0 + $0x8] sm:$0xff]  ;;  %v13_v5 = vld [vmem:[%s1057_s0 + $0x10] sm:$0xff] }
   0x2   :  { %v87_v1 = vld [vmem:[%s1058_s1] sm:$0xff]  ;;  %v88_v4 = vld [vmem:[%s1058_s1 + $0x8] sm:$0xff]  ;;  %v89_v6 = vld [vmem:[%s1058_s1 + $0x10] sm:$0xff] }
   0x3   :  { %v163_v3 = vsub.f32 %v11_v0, %v87_v1  ;;  %v164_v7 = vsub.f32 %v12_v2, %v88_v4  ;;  %v165_v8 = vsub.f32 %v13_v5, %v89_v6  ;;  %v14_v9 = vld [vmem:[%s1057_s0 + $0x18] sm:$0xff]  ;;  %v15_v11 = vld [vmem:[%s1057_s0 + $0x20] sm:$0xff]  ;;  %v16_v14 = vld [vmem:[%s1057_s0 + $0x28] sm:$0xff] }
   0x4   :  { %v90_v10 = vld [vmem:[%s1058_s1 + $0x18] sm:$0xff]  ;;  %v91_v13 = vld [vmem:[%s1058_s1 + $0x20] sm:$0xff]  ;;  %v92_v15 = vld [vmem:[%s1058_s1 + $0x28] sm:$0xff] }
   0x5   :  { %239 = vst [vmem:[%s1059_s2] sm:$0xff] %v163_v3  ;;  %v166_v12 = vsub.f32 %v14_v9, %v90_v10  ;;  %241 = vst.msk [vmem:[%s1059_s2 + $0x8] sm:$0xff] %vm240_vm0, %v164_v7  ;;  %v167_v16 = vsub.f32 %v15_v11, %v91_v13  ;;  %v168_v17 = vsub.f32 %v16_v14, %v92_v15  ;;  %v17_v18 = vld [vmem:[%s1057_s0 + $0x30] sm:$0xff]  ;;  %v18_v20 = vld [vmem:[%s1057_s0 + $0x38] sm:$0xff] }
   0x6   :  { %242 = vst [vmem:[%s1059_s2 + $0x10] sm:$0xff] %v165_v8  ;;  %v93_v19 = vld [vmem:[%s1058_s1 + $0x30] sm:$0xff]  ;;  %v94_v22 = vld [vmem:[%s1058_s1 + $0x38] sm:$0xff]  ;;  %v19_v23 = vld [vmem:[%s1057_s0 + $0x40] sm:$0xff] }
   0x7   :  { %243 = vst.msk [vmem:[%s1059_s2 + $0x18] sm:$0xff] %vm240_vm0, %v166_v12  ;;  %v169_v21 = vsub.f32 %v17_v18, %v93_v19  ;;  %v95_v24 = vld [vmem:[%s1058_s1 + $0x40] sm:$0xff]  ;;  %244 = vst [vmem:[%s1059_s2 + $0x20] sm:$0xff] %v167_v16  ;;  %v170_v25 = vsub.f32 %v18_v20, %v94_v22  ;;  %v20_v27 = vld [vmem:[%s1057_s0 + $0x48] sm:$0xff] }
   0x8   :  { %245 = vst.msk [vmem:[%s1059_s2 + $0x28] sm:$0xff] %vm240_vm0, %v168_v17  ;;  %v171_v26 = vsub.f32 %v19_v23, %v95_v24  ;;  %v96_v28 = vld [vmem:[%s1058_s1 + $0x48] sm:$0xff]  ;;  %v21_v29 = vld [vmem:[%s1057_s0 + $0x50] sm:$0xff]  ;;  %v22_v32 = vld [vmem:[%s1057_s0 + $0x58] sm:$0xff] }
   0x9   :  { %246 = vst [vmem:[%s1059_s2 + $0x30] sm:$0xff] %v169_v21  ;;  %v172_v30 = vsub.f32 %v20_v27, %v96_v28  ;;  %v97_v31 = vld [vmem:[%s1058_s1 + $0x50] sm:$0xff]  ;;  %v98_v33 = vld [vmem:[%s1058_s1 + $0x58] sm:$0xff]  ;;  %247 = vst.msk [vmem:[%s1059_s2 + $0x38] sm:$0xff] %vm240_vm0, %v170_v25 }
   0xa   :  { %248 = vst [vmem:[%s1059_s2 + $0x40] sm:$0xff] %v171_v26  ;;  %v173_v34 = vsub.f32 %v21_v29, %v97_v31  ;;  %v174_v35 = vsub.f32 %v22_v32, %v98_v33  ;;  %v23_v36 = vld [vmem:[%s1057_s0 + $0x60] sm:$0xff]  ;;  %v24_v38 = vld [vmem:[%s1057_s0 + $0x68] sm:$0xff]  ;;  %v25_v41 = vld [vmem:[%s1057_s0 + $0x70] sm:$0xff] }
   0xb   :  { %v99_v37 = vld [vmem:[%s1058_s1 + $0x60] sm:$0xff]  ;;  %249 = vst.msk [vmem:[%s1059_s2 + $0x48] sm:$0xff] %vm240_vm0, %v172_v30  ;;  %v100_v40 = vld [vmem:[%s1058_s1 + $0x68] sm:$0xff]  ;;  %v101_v42 = vld [vmem:[%s1058_s1 + $0x70] sm:$0xff] }
   0xc   :  { %v175_v39 = vsub.f32 %v23_v36, %v99_v37  ;;  %250 = vst [vmem:[%s1059_s2 + $0x50] sm:$0xff] %v173_v34  ;;  %251 = vst.msk [vmem:[%s1059_s2 + $0x58] sm:$0xff] %vm240_vm0, %v174_v35  ;;  %v176_v43 = vsub.f32 %v24_v38, %v100_v40  ;;  %v177_v44 = vsub.f32 %v25_v41, %v101_v42  ;;  %v26_v45 = vld [vmem:[%s1057_s0 + $0x78] sm:$0xff]  ;;  %v27_v47 = vld [vmem:[%s1057_s0 + $0x80] sm:$0xff] }
   0xd   :  { %v102_v46 = vld [vmem:[%s1058_s1 + $0x78] sm:$0xff]  ;;  %v103_v49 = vld [vmem:[%s1058_s1 + $0x80] sm:$0xff]  ;;  %v28_v50 = vld [vmem:[%s1057_s0 + $0x88] sm:$0xff] }
   0xe   :  { %252 = vst [vmem:[%s1059_s2 + $0x60] sm:$0xff] %v175_v39  ;;  %v178_v48 = vsub.f32 %v26_v45, %v102_v46  ;;  %v104_v51 = vld [vmem:[%s1058_s1 + $0x88] sm:$0xff]  ;;  %253 = vst.msk [vmem:[%s1059_s2 + $0x68] sm:$0xff] %vm240_vm0, %v176_v43  ;;  %v179_v52 = vsub.f32 %v27_v47, %v103_v49  ;;  %v29_v54 = vld [vmem:[%s1057_s0 + $0x90] sm:$0xff] }
   0xf   :  { %254 = vst [vmem:[%s1059_s2 + $0x70] sm:$0xff] %v177_v44  ;;  %v180_v53 = vsub.f32 %v28_v50, %v104_v51  ;;  %v105_v55 = vld [vmem:[%s1058_s1 + $0x90] sm:$0xff]  ;;  %v30_v56 = vld [vmem:[%s1057_s0 + $0x98] sm:$0xff]  ;;  %v31_v59 = vld [vmem:[%s1057_s0 + $0xa0] sm:$0xff] }
  0x10   :  { %255 = vst.msk [vmem:[%s1059_s2 + $0x78] sm:$0xff] %vm240_vm0, %v178_v48  ;;  %v181_v57 = vsub.f32 %v29_v54, %v105_v55  ;;  %v106_v58 = vld [vmem:[%s1058_s1 + $0x98] sm:$0xff]  ;;  %v107_v60 = vld [vmem:[%s1058_s1 + $0xa0] sm:$0xff]  ;;  %256 = vst [vmem:[%s1059_s2 + $0x80] sm:$0xff] %v179_v52 }
  0x11   :  { %257 = vst.msk [vmem:[%s1059_s2 + $0x88] sm:$0xff] %vm240_vm0, %v180_v53  ;;  %v182_v61 = vsub.f32 %v30_v56, %v106_v58  ;;  %v183_v62 = vsub.f32 %v31_v59, %v107_v60  ;;  %v32_v63 = vld [vmem:[%s1057_s0 + $0xa8] sm:$0xff]  ;;  %v33_v1 = vld [vmem:[%s1057_s0 + $0xb0] sm:$0xff]  ;;  %v34_v4 = vld [vmem:[%s1057_s0 + $0xb8] sm:$0xff] }
  0x12   :  { %v108_v0 = vld [vmem:[%s1058_s1 + $0xa8] sm:$0xff]  ;;  %258 = vst [vmem:[%s1059_s2 + $0x90] sm:$0xff] %v181_v57  ;;  %v109_v3 = vld [vmem:[%s1058_s1 + $0xb0] sm:$0xff]  ;;  %v110_v5 = vld [vmem:[%s1058_s1 + $0xb8] sm:$0xff] }
  0x13   :  { %v184_v2 = vsub.f32 %v32_v63, %v108_v0  ;;  %259 = vst.msk [vmem:[%s1059_s2 + $0x98] sm:$0xff] %vm240_vm0, %v182_v61  ;;  %260 = vst [vmem:[%s1059_s2 + $0xa0] sm:$0xff] %v183_v62  ;;  %v185_v6 = vsub.f32 %v33_v1, %v109_v3  ;;  %v186_v7 = vsub.f32 %v34_v4, %v110_v5  ;;  %v35_v8 = vld [vmem:[%s1057_s0 + $0xc0] sm:$0xff]  ;;  %v36_v10 = vld [vmem:[%s1057_s0 + $0xc8] sm:$0xff] }
  0x14   :  { %v111_v9 = vld [vmem:[%s1058_s1 + $0xc0] sm:$0xff]  ;;  %v112_v12 = vld [vmem:[%s1058_s1 + $0xc8] sm:$0xff]  ;;  %v37_v13 = vld [vmem:[%s1057_s0 + $0xd0] sm:$0xff] }
  0x15   :  { %261 = vst.msk [vmem:[%s1059_s2 + $0xa8] sm:$0xff] %vm240_vm0, %v184_v2  ;;  %v187_v11 = vsub.f32 %v35_v8, %v111_v9  ;;  %v113_v14 = vld [vmem:[%s1058_s1 + $0xd0] sm:$0xff]  ;;  %262 = vst [vmem:[%s1059_s2 + $0xb0] sm:$0xff] %v185_v6  ;;  %v188_v15 = vsub.f32 %v36_v10, %v112_v12  ;;  %v38_v17 = vld [vmem:[%s1057_s0 + $0xd8] sm:$0xff] }
  0x16   :  { %263 = vst.msk [vmem:[%s1059_s2 + $0xb8] sm:$0xff] %vm240_vm0, %v186_v7  ;;  %v189_v16 = vsub.f32 %v37_v13, %v113_v14  ;;  %v114_v18 = vld [vmem:[%s1058_s1 + $0xd8] sm:$0xff]  ;;  %v39_v19 = vld [vmem:[%s1057_s0 + $0xe0] sm:$0xff]  ;;  %v40_v22 = vld [vmem:[%s1057_s0 + $0xe8] sm:$0xff] }
  0x17   :  { %264 = vst [vmem:[%s1059_s2 + $0xc0] sm:$0xff] %v187_v11  ;;  %v190_v20 = vsub.f32 %v38_v17, %v114_v18  ;;  %v115_v21 = vld [vmem:[%s1058_s1 + $0xe0] sm:$0xff]  ;;  %v116_v23 = vld [vmem:[%s1058_s1 + $0xe8] sm:$0xff]  ;;  %265 = vst.msk [vmem:[%s1059_s2 + $0xc8] sm:$0xff] %vm240_vm0, %v188_v15 }
  0x18   :  { %266 = vst [vmem:[%s1059_s2 + $0xd0] sm:$0xff] %v189_v16  ;;  %v191_v24 = vsub.f32 %v39_v19, %v115_v21  ;;  %v192_v25 = vsub.f32 %v40_v22, %v116_v23  ;;  %v41_v26 = vld [vmem:[%s1057_s0 + $0xf0] sm:$0xff]  ;;  %v42_v28 = vld [vmem:[%s1057_s0 + $0xf8] sm:$0xff]  ;;  %v43_v31 = vld [vmem:[%s1057_s0 + $0x100] sm:$0xff] }
  0x19   :  { %v117_v27 = vld [vmem:[%s1058_s1 + $0xf0] sm:$0xff]  ;;  %267 = vst.msk [vmem:[%s1059_s2 + $0xd8] sm:$0xff] %vm240_vm0, %v190_v20  ;;  %v118_v30 = vld [vmem:[%s1058_s1 + $0xf8] sm:$0xff]  ;;  %v119_v32 = vld [vmem:[%s1058_s1 + $0x100] sm:$0xff] }
  0x1a   :  { %v193_v29 = vsub.f32 %v41_v26, %v117_v27  ;;  %268 = vst [vmem:[%s1059_s2 + $0xe0] sm:$0xff] %v191_v24  ;;  %269 = vst.msk [vmem:[%s1059_s2 + $0xe8] sm:$0xff] %vm240_vm0, %v192_v25  ;;  %v194_v33 = vsub.f32 %v42_v28, %v118_v30  ;;  %v195_v34 = vsub.f32 %v43_v31, %v119_v32  ;;  %v44_v35 = vld [vmem:[%s1057_s0 + $0x108] sm:$0xff]  ;;  %v45_v37 = vld [vmem:[%s1057_s0 + $0x110] sm:$0xff] }
  0x1b   :  { %v120_v36 = vld [vmem:[%s1058_s1 + $0x108] sm:$0xff]  ;;  %v121_v39 = vld [vmem:[%s1058_s1 + $0x110] sm:$0xff]  ;;  %v46_v40 = vld [vmem:[%s1057_s0 + $0x118] sm:$0xff] }
  0x1c   :  { %270 = vst [vmem:[%s1059_s2 + $0xf0] sm:$0xff] %v193_v29  ;;  %v196_v38 = vsub.f32 %v44_v35, %v120_v36  ;;  %v122_v41 = vld [vmem:[%s1058_s1 + $0x118] sm:$0xff]  ;;  %271 = vst.msk [vmem:[%s1059_s2 + $0xf8] sm:$0xff] %vm240_vm0, %v194_v33  ;;  %v197_v42 = vsub.f32 %v45_v37, %v121_v39  ;;  %v47_v44 = vld [vmem:[%s1057_s0 + $0x120] sm:$0xff] }
  0x1d   :  { %272 = vst [vmem:[%s1059_s2 + $0x100] sm:$0xff] %v195_v34  ;;  %v198_v43 = vsub.f32 %v46_v40, %v122_v41  ;;  %v123_v45 = vld [vmem:[%s1058_s1 + $0x120] sm:$0xff]  ;;  %v48_v46 = vld [vmem:[%s1057_s0 + $0x128] sm:$0xff]  ;;  %v49_v49 = vld [vmem:[%s1057_s0 + $0x130] sm:$0xff] }
  0x1e   :  { %273 = vst.msk [vmem:[%s1059_s2 + $0x108] sm:$0xff] %vm240_vm0, %v196_v38  ;;  %v199_v47 = vsub.f32 %v47_v44, %v123_v45  ;;  %v124_v48 = vld [vmem:[%s1058_s1 + $0x128] sm:$0xff]  ;;  %v125_v50 = vld [vmem:[%s1058_s1 + $0x130] sm:$0xff]  ;;  %274 = vst [vmem:[%s1059_s2 + $0x110] sm:$0xff] %v197_v42 }
  0x1f   :  { %275 = vst.msk [vmem:[%s1059_s2 + $0x118] sm:$0xff] %vm240_vm0, %v198_v43  ;;  %v200_v51 = vsub.f32 %v48_v46, %v124_v48  ;;  %v201_v52 = vsub.f32 %v49_v49, %v125_v50  ;;  %v50_v53 = vld [vmem:[%s1057_s0 + $0x138] sm:$0xff]  ;;  %v51_v55 = vld [vmem:[%s1057_s0 + $0x140] sm:$0xff]  ;;  %v52_v58 = vld [vmem:[%s1057_s0 + $0x148] sm:$0xff] }
  0x20   :  { %v126_v54 = vld [vmem:[%s1058_s1 + $0x138] sm:$0xff]  ;;  %276 = vst [vmem:[%s1059_s2 + $0x120] sm:$0xff] %v199_v47  ;;  %v127_v57 = vld [vmem:[%s1058_s1 + $0x140] sm:$0xff]  ;;  %v128_v59 = vld [vmem:[%s1058_s1 + $0x148] sm:$0xff] }
  0x21   :  { %v202_v56 = vsub.f32 %v50_v53, %v126_v54  ;;  %277 = vst.msk [vmem:[%s1059_s2 + $0x128] sm:$0xff] %vm240_vm0, %v200_v51  ;;  %278 = vst [vmem:[%s1059_s2 + $0x130] sm:$0xff] %v201_v52  ;;  %v203_v60 = vsub.f32 %v51_v55, %v127_v57  ;;  %v204_v61 = vsub.f32 %v52_v58, %v128_v59  ;;  %v53_v62 = vld [vmem:[%s1057_s0 + $0x150] sm:$0xff]  ;;  %v54_v0 = vld [vmem:[%s1057_s0 + $0x158] sm:$0xff] }
  0x22   :  { %v129_v63 = vld [vmem:[%s1058_s1 + $0x150] sm:$0xff]  ;;  %v130_v2 = vld [vmem:[%s1058_s1 + $0x158] sm:$0xff]  ;;  %v55_v3 = vld [vmem:[%s1057_s0 + $0x160] sm:$0xff] }
  0x23   :  { %279 = vst.msk [vmem:[%s1059_s2 + $0x138] sm:$0xff] %vm240_vm0, %v202_v56  ;;  %v205_v1 = vsub.f32 %v53_v62, %v129_v63  ;;  %v131_v4 = vld [vmem:[%s1058_s1 + $0x160] sm:$0xff]  ;;  %280 = vst [vmem:[%s1059_s2 + $0x140] sm:$0xff] %v203_v60  ;;  %v206_v5 = vsub.f32 %v54_v0, %v130_v2  ;;  %v56_v7 = vld [vmem:[%s1057_s0 + $0x168] sm:$0xff] }
  0x24   :  { %281 = vst.msk [vmem:[%s1059_s2 + $0x148] sm:$0xff] %vm240_vm0, %v204_v61  ;;  %v207_v6 = vsub.f32 %v55_v3, %v131_v4  ;;  %v132_v8 = vld [vmem:[%s1058_s1 + $0x168] sm:$0xff]  ;;  %v57_v9 = vld [vmem:[%s1057_s0 + $0x170] sm:$0xff]  ;;  %v58_v12 = vld [vmem:[%s1057_s0 + $0x178] sm:$0xff] }
  0x25   :  { %282 = vst [vmem:[%s1059_s2 + $0x150] sm:$0xff] %v205_v1  ;;  %v208_v10 = vsub.f32 %v56_v7, %v132_v8  ;;  %v133_v11 = vld [vmem:[%s1058_s1 + $0x170] sm:$0xff]  ;;  %v134_v13 = vld [vmem:[%s1058_s1 + $0x178] sm:$0xff]  ;;  %283 = vst.msk [vmem:[%s1059_s2 + $0x158] sm:$0xff] %vm240_vm0, %v206_v5 }
  0x26   :  { %284 = vst [vmem:[%s1059_s2 + $0x160] sm:$0xff] %v207_v6  ;;  %v209_v14 = vsub.f32 %v57_v9, %v133_v11  ;;  %v210_v15 = vsub.f32 %v58_v12, %v134_v13  ;;  %v59_v16 = vld [vmem:[%s1057_s0 + $0x180] sm:$0xff]  ;;  %v60_v18 = vld [vmem:[%s1057_s0 + $0x188] sm:$0xff]  ;;  %v61_v21 = vld [vmem:[%s1057_s0 + $0x190] sm:$0xff] }
  0x27   :  { %v135_v17 = vld [vmem:[%s1058_s1 + $0x180] sm:$0xff]  ;;  %285 = vst.msk [vmem:[%s1059_s2 + $0x168] sm:$0xff] %vm240_vm0, %v208_v10  ;;  %v136_v20 = vld [vmem:[%s1058_s1 + $0x188] sm:$0xff]  ;;  %v137_v22 = vld [vmem:[%s1058_s1 + $0x190] sm:$0xff] }
  0x28   :  { %v211_v19 = vsub.f32 %v59_v16, %v135_v17  ;;  %286 = vst [vmem:[%s1059_s2 + $0x170] sm:$0xff] %v209_v14  ;;  %287 = vst.msk [vmem:[%s1059_s2 + $0x178] sm:$0xff] %vm240_vm0, %v210_v15  ;;  %v212_v23 = vsub.f32 %v60_v18, %v136_v20  ;;  %v213_v24 = vsub.f32 %v61_v21, %v137_v22  ;;  %v62_v25 = vld [vmem:[%s1057_s0 + $0x198] sm:$0xff]  ;;  %v63_v27 = vld [vmem:[%s1057_s0 + $0x1a0] sm:$0xff] }
  0x29   :  { %v138_v26 = vld [vmem:[%s1058_s1 + $0x198] sm:$0xff]  ;;  %v139_v29 = vld [vmem:[%s1058_s1 + $0x1a0] sm:$0xff]  ;;  %v64_v30 = vld [vmem:[%s1057_s0 + $0x1a8] sm:$0xff] }
  0x2a   :  { %288 = vst [vmem:[%s1059_s2 + $0x180] sm:$0xff] %v211_v19  ;;  %v214_v28 = vsub.f32 %v62_v25, %v138_v26  ;;  %v140_v31 = vld [vmem:[%s1058_s1 + $0x1a8] sm:$0xff]  ;;  %289 = vst.msk [vmem:[%s1059_s2 + $0x188] sm:$0xff] %vm240_vm0, %v212_v23  ;;  %v215_v32 = vsub.f32 %v63_v27, %v139_v29  ;;  %v65_v34 = vld [vmem:[%s1057_s0 + $0x1b0] sm:$0xff] }
  0x2b   :  { %290 = vst [vmem:[%s1059_s2 + $0x190] sm:$0xff] %v213_v24  ;;  %v216_v33 = vsub.f32 %v64_v30, %v140_v31  ;;  %v141_v35 = vld [vmem:[%s1058_s1 + $0x1b0] sm:$0xff]  ;;  %v66_v36 = vld [vmem:[%s1057_s0 + $0x1b8] sm:$0xff]  ;;  %v67_v39 = vld [vmem:[%s1057_s0 + $0x1c0] sm:$0xff] }
  0x2c   :  { %291 = vst.msk [vmem:[%s1059_s2 + $0x198] sm:$0xff] %vm240_vm0, %v214_v28  ;;  %v217_v37 = vsub.f32 %v65_v34, %v141_v35  ;;  %v142_v38 = vld [vmem:[%s1058_s1 + $0x1b8] sm:$0xff]  ;;  %v143_v40 = vld [vmem:[%s1058_s1 + $0x1c0] sm:$0xff]  ;;  %292 = vst [vmem:[%s1059_s2 + $0x1a0] sm:$0xff] %v215_v32 }
  0x2d   :  { %293 = vst.msk [vmem:[%s1059_s2 + $0x1a8] sm:$0xff] %vm240_vm0, %v216_v33  ;;  %v218_v41 = vsub.f32 %v66_v36, %v142_v38  ;;  %v219_v42 = vsub.f32 %v67_v39, %v143_v40  ;;  %v68_v43 = vld [vmem:[%s1057_s0 + $0x1c8] sm:$0xff]  ;;  %v69_v45 = vld [vmem:[%s1057_s0 + $0x1d0] sm:$0xff]  ;;  %v70_v48 = vld [vmem:[%s1057_s0 + $0x1d8] sm:$0xff] }
  0x2e   :  { %v144_v44 = vld [vmem:[%s1058_s1 + $0x1c8] sm:$0xff]  ;;  %294 = vst [vmem:[%s1059_s2 + $0x1b0] sm:$0xff] %v217_v37  ;;  %v145_v47 = vld [vmem:[%s1058_s1 + $0x1d0] sm:$0xff]  ;;  %v146_v49 = vld [vmem:[%s1058_s1 + $0x1d8] sm:$0xff] }
  0x2f   :  { %v220_v46 = vsub.f32 %v68_v43, %v144_v44  ;;  %295 = vst.msk [vmem:[%s1059_s2 + $0x1b8] sm:$0xff] %vm240_vm0, %v218_v41  ;;  %296 = vst [vmem:[%s1059_s2 + $0x1c0] sm:$0xff] %v219_v42  ;;  %v221_v50 = vsub.f32 %v69_v45, %v145_v47  ;;  %v222_v51 = vsub.f32 %v70_v48, %v146_v49  ;;  %v71_v52 = vld [vmem:[%s1057_s0 + $0x1e0] sm:$0xff]  ;;  %v72_v54 = vld [vmem:[%s1057_s0 + $0x1e8] sm:$0xff] }
  0x30   :  { %v147_v53 = vld [vmem:[%s1058_s1 + $0x1e0] sm:$0xff]  ;;  %v148_v56 = vld [vmem:[%s1058_s1 + $0x1e8] sm:$0xff]  ;;  %v73_v57 = vld [vmem:[%s1057_s0 + $0x1f0] sm:$0xff] }
  0x31   :  { %297 = vst.msk [vmem:[%s1059_s2 + $0x1c8] sm:$0xff] %vm240_vm0, %v220_v46  ;;  %v223_v55 = vsub.f32 %v71_v52, %v147_v53  ;;  %v149_v58 = vld [vmem:[%s1058_s1 + $0x1f0] sm:$0xff]  ;;  %298 = vst [vmem:[%s1059_s2 + $0x1d0] sm:$0xff] %v221_v50  ;;  %v224_v59 = vsub.f32 %v72_v54, %v148_v56  ;;  %v74_v61 = vld [vmem:[%s1057_s0 + $0x1f8] sm:$0xff] }
  0x32   :  { %299 = vst.msk [vmem:[%s1059_s2 + $0x1d8] sm:$0xff] %vm240_vm0, %v222_v51  ;;  %v225_v60 = vsub.f32 %v73_v57, %v149_v58  ;;  %v150_v62 = vld [vmem:[%s1058_s1 + $0x1f8] sm:$0xff]  ;;  %v75_v63 = vld [vmem:[%s1057_s0 + $0x200] sm:$0xff]  ;;  %v76_v2 = vld [vmem:[%s1057_s0 + $0x208] sm:$0xff] }
  0x33   :  { %300 = vst [vmem:[%s1059_s2 + $0x1e0] sm:$0xff] %v223_v55  ;;  %v226_v0 = vsub.f32 %v74_v61, %v150_v62  ;;  %v151_v1 = vld [vmem:[%s1058_s1 + $0x200] sm:$0xff]  ;;  %v152_v3 = vld [vmem:[%s1058_s1 + $0x208] sm:$0xff]  ;;  %301 = vst.msk [vmem:[%s1059_s2 + $0x1e8] sm:$0xff] %vm240_vm0, %v224_v59 }
  0x34   :  { %302 = vst [vmem:[%s1059_s2 + $0x1f0] sm:$0xff] %v225_v60  ;;  %v227_v4 = vsub.f32 %v75_v63, %v151_v1  ;;  %v228_v5 = vsub.f32 %v76_v2, %v152_v3  ;;  %v77_v6 = vld [vmem:[%s1057_s0 + $0x210] sm:$0xff]  ;;  %v78_v8 = vld [vmem:[%s1057_s0 + $0x218] sm:$0xff]  ;;  %v79_v11 = vld [vmem:[%s1057_s0 + $0x220] sm:$0xff] }
  0x35   :  { %v153_v7 = vld [vmem:[%s1058_s1 + $0x210] sm:$0xff]  ;;  %303 = vst.msk [vmem:[%s1059_s2 + $0x1f8] sm:$0xff] %vm240_vm0, %v226_v0  ;;  %v154_v10 = vld [vmem:[%s1058_s1 + $0x218] sm:$0xff]  ;;  %v155_v12 = vld [vmem:[%s1058_s1 + $0x220] sm:$0xff] }
  0x36   :  { %v229_v9 = vsub.f32 %v77_v6, %v153_v7  ;;  %304 = vst [vmem:[%s1059_s2 + $0x200] sm:$0xff] %v227_v4  ;;  %305 = vst.msk [vmem:[%s1059_s2 + $0x208] sm:$0xff] %vm240_vm0, %v228_v5  ;;  %v230_v13 = vsub.f32 %v78_v8, %v154_v10  ;;  %v231_v14 = vsub.f32 %v79_v11, %v155_v12  ;;  %v80_v15 = vld [vmem:[%s1057_s0 + $0x228] sm:$0xff]  ;;  %v81_v17 = vld [vmem:[%s1057_s0 + $0x230] sm:$0xff] }
  0x37   :  { %v156_v16 = vld [vmem:[%s1058_s1 + $0x228] sm:$0xff]  ;;  %v157_v19 = vld [vmem:[%s1058_s1 + $0x230] sm:$0xff]  ;;  %v82_v20 = vld [vmem:[%s1057_s0 + $0x238] sm:$0xff] }
  0x38   :  { %306 = vst [vmem:[%s1059_s2 + $0x210] sm:$0xff] %v229_v9  ;;  %v232_v18 = vsub.f32 %v80_v15, %v156_v16  ;;  %v158_v21 = vld [vmem:[%s1058_s1 + $0x238] sm:$0xff]  ;;  %307 = vst.msk [vmem:[%s1059_s2 + $0x218] sm:$0xff] %vm240_vm0, %v230_v13  ;;  %v233_v22 = vsub.f32 %v81_v17, %v157_v19  ;;  %v83_v24 = vld [vmem:[%s1057_s0 + $0x240] sm:$0xff] }
  0x39   :  { %308 = vst [vmem:[%s1059_s2 + $0x220] sm:$0xff] %v231_v14  ;;  %v234_v23 = vsub.f32 %v82_v20, %v158_v21  ;;  %v159_v25 = vld [vmem:[%s1058_s1 + $0x240] sm:$0xff]  ;;  %v84_v26 = vld [vmem:[%s1057_s0 + $0x248] sm:$0xff]  ;;  %v85_v29 = vld [vmem:[%s1057_s0 + $0x250] sm:$0xff] }
  0x3a   :  { %309 = vst.msk [vmem:[%s1059_s2 + $0x228] sm:$0xff] %vm240_vm0, %v232_v18  ;;  %v235_v27 = vsub.f32 %v83_v24, %v159_v25  ;;  %v160_v28 = vld [vmem:[%s1058_s1 + $0x248] sm:$0xff]  ;;  %v161_v30 = vld [vmem:[%s1058_s1 + $0x250] sm:$0xff]  ;;  %310 = vst [vmem:[%s1059_s2 + $0x230] sm:$0xff] %v233_v22 }
  0x3b   :  { %311 = vst.msk [vmem:[%s1059_s2 + $0x238] sm:$0xff] %vm240_vm0, %v234_v23  ;;  %v236_v31 = vsub.f32 %v84_v26, %v160_v28  ;;  %v237_v32 = vsub.f32 %v85_v29, %v161_v30  ;;  %v86_v33 = vld [vmem:[%s1057_s0 + $0x258] sm:$0xff] }
  0x3c   :  { %v162_v34 = vld [vmem:[%s1058_s1 + $0x258] sm:$0xff]  ;;  %312 = vst [vmem:[%s1059_s2 + $0x240] sm:$0xff] %v235_v27 }
  0x3d   :  { %v238_v35 = vsub.f32 %v86_v33, %v162_v34  ;;  %313 = vst.msk [vmem:[%s1059_s2 + $0x248] sm:$0xff] %vm240_vm0, %v236_v31  ;;  %314 = vst [vmem:[%s1059_s2 + $0x250] sm:$0xff] %v237_v32 }
  0x3f   :  { %315 = vst.msk [vmem:[%s1059_s2 + $0x258] sm:$0xff] %vm240_vm0, %v238_v35 }

</bundles_post_ra>
